<compile_context>
chip_gen: v5e
topology: v5e:2x2
jax: 0.10.0
libtpu: 0.0.40
codegen_flags: <defaults>
</compile_context>

<pallas_src>
import functools

import jax
import jax.numpy as jnp
from jax.experimental import pallas as pl
from jax.experimental.pallas import tpu as pltpu


def _self_attention_kernel(x_ref, w_qkv_ref, o_ref, *, d_out, scale):
    x = x_ref[...]
    op_dtype = x.dtype  # bf16 callers get the bf16 MXU path end-to-end.

    # Single fused projection: (S, d_in) @ (d_in, 3*d_out) -> (S, 3*d_out),
    # f32 accumulation on the MXU.
    qkv = jnp.dot(x, w_qkv_ref[...], preferred_element_type=jnp.float32)

    # Static slices for Q / K / V (lane-tile aligned once d_out % 128 == 0;
    # at small d_out the intra-tile shuffle is negligible).
    queries = qkv[:, 0 * d_out:1 * d_out]
    keys    = qkv[:, 1 * d_out:2 * d_out]
    values  = qkv[:, 2 * d_out:3 * d_out]

    # Fold 1/sqrt(d_k) into Q (S*d_out VPU mults instead of S*S on scores),
    # then drop back to the operand dtype for the second MXU stage.
    queries = (queries * jnp.float32(scale)).astype(op_dtype)
    keys = keys.astype(op_dtype)

    # scores = Q @ K^T without materialising a transpose: contract last axes.
    scores = jax.lax.dot_general(
        queries, keys,
        dimension_numbers=(((1,), (1,)), ((), ())),
        preferred_element_type=jnp.float32)                      # (S, S)

    # Numerically-stable softmax along the last axis.  Exact divide: the
    # denominator is only (S, 1), so the approx EUP reciprocal buys nothing
    # and would loosen accuracy.
    m = jnp.max(scores, axis=-1, keepdims=True)
    e = jnp.exp(scores - m)
    attn_weights = e / jnp.sum(e, axis=-1, keepdims=True)

    # Context vectors: weights @ V -> (S, d_out), f32 accumulation on the MXU.
    context = jnp.dot(attn_weights.astype(op_dtype), values.astype(op_dtype),
                      preferred_element_type=jnp.float32)
    o_ref[...] = context.astype(o_ref.dtype)


def self_attention_v1(x, w_query, w_key, w_value):
    """x: (S, d_in), w_*: (d_in, d_out) -> (S, d_out)."""
    S, d_in = x.shape
    d_out = w_query.shape[1]

    # Fuse the three projection weights into one operand so the kernel issues
    # one projection matmul and two input DMAs instead of four.  The weights
    # are per-call constants; under jit this concat is hoisted/folded.
    w_qkv = jnp.concatenate([w_query, w_key, w_value], axis=1)

    kernel = functools.partial(
        _self_attention_kernel,
        d_out=d_out,
        scale=1.0 / float(d_out) ** 0.5)   # d_k = d_out, matches torch

    return pl.pallas_call(
        kernel,
        out_shape=jax.ShapeDtypeStruct((S, d_out), x.dtype),
        grid_spec=pl.GridSpec(
            grid=(1,),
            in_specs=[
                pl.BlockSpec((S, d_in), lambda i: (0, 0)),
                pl.BlockSpec((d_in, 3 * d_out), lambda i: (0, 0)),
            ],
            out_specs=pl.BlockSpec((S, d_out), lambda i: (0, 0)),
        ),
        compiler_params=pltpu.CompilerParams(
            dimension_semantics=("arbitrary",)),
    )(x, w_qkv)


def self_attention_ref(x, w_query, w_key, w_value):
    """Pure-JAX reference mirroring the PyTorch forward."""
    keys = x @ w_key
    queries = x @ w_query
    values = x @ w_value
    attn_scores = queries @ keys.T
    d_k = keys.shape[-1]
    attn_weights = jax.nn.softmax(attn_scores / jnp.sqrt(jnp.float32(d_k)),
                                  axis=-1)
    return attn_weights @ values


if __name__ == "__main__":
    key = jax.random.PRNGKey(0)
    seq, d_in, d_out = 8, 32, 32

    k_x, k_q, k_k, k_v = jax.random.split(key, 4)
    x = jax.random.normal(k_x, (seq, d_in), dtype=jnp.float32)
    # torch.rand -> uniform [0, 1); replicate deterministically.
    w_query = jax.random.uniform(k_q, (d_in, d_out), dtype=jnp.float32)
    w_key   = jax.random.uniform(k_k, (d_in, d_out), dtype=jnp.float32)
    w_value = jax.random.uniform(k_v, (d_in, d_out), dtype=jnp.float32)

    out = self_attention_v1(x, w_query, w_key, w_value)
    out = jax.block_until_ready(out)

    ref = self_attention_ref(x, w_query, w_key, w_value)
    assert out.shape == (seq, d_out)
    assert jnp.allclose(out, ref, atol=1e-4, rtol=1e-4), "mismatch vs reference"

    print("KERNEL_OK")
</pallas_src>

<mosaic_0001>
module attributes {stable_mosaic.version = 11 : i64} {
  func.func @_self_attention_kernel(%arg0: i32, %arg1: memref<8x32xf32, #tpu.memory_space<vmem>>, %arg2: memref<32x96xf32, #tpu.memory_space<vmem>>, %arg3: memref<8x32xf32, #tpu.memory_space<vmem>>) attributes {dimension_semantics = [#tpu.dimension_semantics<arbitrary>], iteration_bounds = array<i64: 1>, scalar_prefetch = 0 : i64, scratch_operands = 0 : i64, tpu.core_type = #tpu.core_type<tc>, window_params = [{pipeline_mode = #tpu.pipeline_mode<synchronous>, transform_indices = @transform_0, window_bounds = array<i64: 8, 32>}, {pipeline_mode = #tpu.pipeline_mode<synchronous>, transform_indices = @transform_1, window_bounds = array<i64: 32, 96>}, {pipeline_mode = #tpu.pipeline_mode<synchronous>, transform_indices = @transform_2, window_bounds = array<i64: 8, 32>}]} {
    %c0 = arith.constant 0 : index
    %c0_0 = arith.constant 0 : index
    %0 = vector.load %arg1[%c0, %c0_0] : memref<8x32xf32, #tpu.memory_space<vmem>>, vector<8x32xf32>
    %c0_1 = arith.constant 0 : index
    %c0_2 = arith.constant 0 : index
    %1 = vector.load %arg2[%c0_1, %c0_2] : memref<32x96xf32, #tpu.memory_space<vmem>>, vector<32x96xf32>
    %cst = arith.constant dense<0.000000e+00> : vector<8x96xf32>
    %2 = tpu.matmul %0, %1, %cst {dimension_numbers = #tpu.dot_dimension_numbers<[1], [0], [0], [1], [0, 0, 1, 1], [], []>} : vector<8x32xf32>, vector<32x96xf32>, vector<8x96xf32> -> vector<8x96xf32>
    %3 = vector.extract_strided_slice %2 {offsets = [0, 0], sizes = [8, 32], strides = [1, 1]} : vector<8x96xf32> to vector<8x32xf32>
    %4 = vector.extract_strided_slice %2 {offsets = [0, 32], sizes = [8, 32], strides = [1, 1]} : vector<8x96xf32> to vector<8x32xf32>
    %5 = vector.extract_strided_slice %2 {offsets = [0, 64], sizes = [8, 32], strides = [1, 1]} : vector<8x96xf32> to vector<8x32xf32>
    %cst_3 = arith.constant 0.176776692 : f32
    %6 = vector.broadcast %cst_3 : f32 to vector<8x32xf32>
    %7 = arith.mulf %3, %6 : vector<8x32xf32>
    %cst_4 = arith.constant dense<0.000000e+00> : vector<8x8xf32>
    %8 = tpu.matmul %7, %4, %cst_4 {dimension_numbers = #tpu.dot_dimension_numbers<[1], [1], [0], [0], [0, 0, 1, 0], [], []>} : vector<8x32xf32>, vector<8x32xf32>, vector<8x8xf32> -> vector<8x8xf32>
    %cst_5 = arith.constant dense<0xFF800000> : vector<8xf32>
    %9 = vector.multi_reduction <maximumf>, %8, %cst_5 [1] : vector<8x8xf32> to vector<8xf32>
    %10 = vector.shape_cast %9 : vector<8xf32> to vector<8x1xf32>
    %11 = vector.broadcast %10 : vector<8x1xf32> to vector<8x8xf32>
    %12 = arith.subf %8, %11 : vector<8x8xf32>
    %13 = math.exp %12 : vector<8x8xf32>
    %cst_6 = arith.constant dense<0.000000e+00> : vector<8xf32>
    %14 = vector.multi_reduction <add>, %13, %cst_6 [1] : vector<8x8xf32> to vector<8xf32>
    %15 = vector.shape_cast %14 : vector<8xf32> to vector<8x1xf32>
    %16 = vector.broadcast %15 : vector<8x1xf32> to vector<8x8xf32>
    %17 = arith.divf %13, %16 : vector<8x8xf32>
    %cst_7 = arith.constant dense<0.000000e+00> : vector<8x32xf32>
    %18 = tpu.matmul %17, %5, %cst_7 {dimension_numbers = #tpu.dot_dimension_numbers<[1], [0], [0], [1], [0, 0, 1, 1], [], []>} : vector<8x8xf32>, vector<8x32xf32>, vector<8x32xf32> -> vector<8x32xf32>
    %c0_8 = arith.constant 0 : index
    %c0_9 = arith.constant 0 : index
    %19 = vector.load %arg3[%c0_8, %c0_9] : memref<8x32xf32, #tpu.memory_space<vmem>>, vector<8x32xf32>
    tpu.vector_store %arg3[%c0_8, %c0_9], %18 {strides = array<i32>} : memref<8x32xf32, #tpu.memory_space<vmem>>, vector<8x32xf32>,
    return
  }
  func.func @transform_0(%arg0: i32) -> (i32, i32) {
    %c0_i32 = arith.constant 0 : i32
    %c0_i32_0 = arith.constant 0 : i32
    %c0_i32_1 = arith.constant 0 : i32
    return %c0_i32, %c0_i32_0 : i32, i32
  }
  func.func @transform_1(%arg0: i32) -> (i32, i32) {
    %c0_i32 = arith.constant 0 : i32
    %c0_i32_0 = arith.constant 0 : i32
    %c0_i32_1 = arith.constant 0 : i32
    return %c0_i32, %c0_i32_0 : i32, i32
  }
  func.func @transform_2(%arg0: i32) -> (i32, i32) {
    %c0_i32 = arith.constant 0 : i32
    %c0_i32_0 = arith.constant 0 : i32
    %c0_i32_1 = arith.constant 0 : i32
    return %c0_i32, %c0_i32_0 : i32, i32
  }
}

</mosaic_0001>

<bundles_post_ra>
// kernel: tpu_custom_call.1
= control target key start
LH: loop header
LB: loop body
LE: loop exit
PB: predicated region body
PF: predicated region fallthrough
CT: control target
= control target key end

     0   :  { %7 = vsyncpa [#allocation3], 0  ;;  %s301_s0 = inlined_call_operand.hbm [shape: f32[8,32], index: 0, kind: input, shape index: {}]   ;;  %s302_s1 = inlined_call_operand.hbm [shape: f32[32,96], index: 1, kind: input, shape index: {}]   ;;  %s303_s2 = inlined_call_operand.hbm [shape: f32[8,32], index: 2, kind: output, shape index: {}]  }
   0x1   :  { %8 = vsyncpa [#allocation6], 0 }
   0x2   :  { %9 = vsyncpa [#allocation4], 0  ;;  %s15_s11 = sshll.u32 %s301_s0, 4  ;;  %s263_s12 = smov [#allocation2]   ;;  %s16_s11 = int_to_ptr.hbm [resolvable:$true] %s15_s11 }
   0x3   :  { %s17_s13 = sshll.u32 %s263_s12, 4  ;;  %s25_s16 = sshll.u32 %s302_s1, 4  ;;  %s18_s13 = int_to_ptr.vmem [resolvable:$true] %s17_s13  ;;  %s26_s16 = int_to_ptr.hbm [resolvable:$true] %s25_s16 }
   0x4   :  { %20 = dma.hbm_to_vmem [thread:$0]  %s16_s11, 128, %s18_s13, [#allocation3]  }
   0x5   :  { %s264_s17 = smov [#allocation5]   ;;  %s265_s19 = smov 128  }
   0x6   :  { %s27_s18 = sshll.u32 %s264_s17, 4  ;;  %s266_s20 = smov 8   ;;  %s28_s18 = int_to_ptr.vmem [resolvable:$true] %s27_s18 }
   0x7   :  { %33 = dma.hbm_to_vmem [thread:$0]  %s26_s16, 512, %s28_s18, [#allocation6], %s265_s19, %s265_s19, %s266_s20  }
   0x8   :  { %257 = dma.done.wait [#allocation3], 128  }
   0x9   :  { %258 = vsyncadd [#allocation3], 4294967168 }
   0xa   :  { %259 = dma.done.wait [#allocation6], 512  }
   0xb   :  { %260 = vsyncadd [#allocation6], 4294966784  ;;  %v46_v0 = vld [vmem:[#allocation5 + $0x18] sm:$0xff]  ;;  %v45_v1 = vld [vmem:[#allocation5 + $0x10] sm:$0xff]  ;;  %vm47_vm0 = vcmask 261120   ;;  %s267_s0 = smov 96  }
   0xc   :  { %63 = vmatpush.msra.mxu0 %v46_v0  ;;  %v44_v2 = vld [vmem:[#allocation5 + $0x8] sm:$0xff]  ;;  %v43_v3 = vld [vmem:[#allocation5] sm:$0xff]  ;;  %v42_v4 = vld [vmem:[#allocation2] sm:$0xff]  ;;  %vm100_vm1 = vcmask 64512   ;;  %s268_s1 = smov 64   ;;  %s269_s21 = smov [#allocation7]  }
   0xd   :  { %s157_s22 = sshll.u32 %s269_s21, 4  ;;  %s159_s25 = sshll.u32 %s303_s2, 4  ;;  %s158_s22 = int_to_ptr.vmem [resolvable:$true] %s157_s22  ;;  %s160_s25 = int_to_ptr.hbm [resolvable:$true] %s159_s25 }
   0xe   :  { %64 = vmatpush.msra.mxu0 %v45_v1 }
  0x10   :  { %65 = vmatpush.msra.mxu0 %v44_v2 }
  0x12   :  { %66 = vmatpush.msra.mxu0 %v43_v3 }
  0x13   :  { %170 = vmatmul.msk.f32.vlgmr.msra.gmra.mxu0 %vm47_vm0, %v42_v4 }
  0x90   :  { %v68_v5 = vpop.f32.mrf.mxu0 }
  0x91   :  { %73 = vrot.lane.b32.xlu0 %v68_v5, %s267_s0  ;;  %v71_v7 = vmul.f32 0.17677669, %v68_v5 }
 0x103   :  { %v74_v6 = vpop.permute.xlu0 %73 }
 0x104   :  { %171 = vmatpush.xpose.msk.msra.mxu1 %vm47_vm0, %v74_v6 }
 0x107   :  { %172 = vmatmul.msk.f32.vlgmr.msra.gmra.mxu1 %vm47_vm0, %v71_v7 }
 0x184   :  { %v97_v8 = vpop.f32.mrf.mxu1 }
 0x185   :  { %v101_v9 = vsel %vm100_vm1, %v97_v8, -inf }
 0x186   :  { %102 = vmax.xlane.f32.xlu0 %v101_v9 }
 0x1f9   :  { %v103_v10 = vpop.xlane.xlu0 %102 }
 0x1fa   :  { %v104_v11 = vsub.f32 %v97_v8, %v103_v10 }
 0x1fc   :  { %v105_v12 = vmul.f32 1.442695, %v104_v11 }
 0x1fe   :  { %181 = vpow2.f32 %v105_v12 }
 0x204   :  { %v182_v13 = vpop.eup %181 }
 0x205   :  { %v107_v14 = vsel %vm100_vm1, %v182_v13, 0.0 }
 0x206   :  { %108 = vadd.xlane.f32.xlu1 %v107_v14 }
 0x21f   :  { %125 = vrot.lane.b32.xlu1 %v68_v5, %s268_s1 }
 0x279   :  { %v109_v15 = vpop.xlane.xlu1 %108 }
 0x27a   :  { %183 = vrcp.f32 %v109_v15  ;;  %v121_v21 = vand.u32 2147483648, %v109_v15  ;;  %vm115_vm3 = vweird.f32 %v109_v15  ;;  %v119_v22 = vand.u32 2147483647, %v109_v15 }
 0x27c   :  { %v122_v24 = vor.u32 1.1754944e-38, %v121_v21  ;;  %vm120_vm5 = vcmp.eq.f32.partialorder %v119_v22, 8.507059e+37 }
 0x280   :  { %v184_v16 = vpop.eup %183 }
 0x281   :  { %v111_v17 = vmul.f32 %v184_v16, %v109_v15  ;;  %vm116_vm2 = vweird.f32 %v184_v16 }
 0x282   :  { %vm117_vm4 = vmor %vm115_vm3, %vm116_vm2 }
 0x283   :  { %v112_v18 = vsub.f32 1.0, %v111_v17 }
 0x285   :  { %v113_v19 = vmul.f32 %v184_v16, %v112_v18 }
 0x287   :  { %v114_v20 = vadd.f32 %v184_v16, %v113_v19 }
 0x289   :  { %v118_v23 = vsel %vm117_vm4, %v184_v16, %v114_v20 }
 0x28a   :  { %v123_v25 = vsel %vm120_vm5, %v122_v24, %v118_v23 }
 0x28b   :  { %v124_v27 = vmul.f32 %v182_v13, %v123_v25 }
 0x291   :  { %v126_v26 = vpop.permute.xlu1 %125 }
 0x292   :  { %146 = vmatpush.msra.mxu2 %v126_v26 }
 0x293   :  { %173 = vmatmul.msk.f32.vlgmr.msra.gmra.mxu2 %vm100_vm1, %v124_v27 }
 0x316   :  { %v148_v28 = vpop.f32.mrf.mxu2 }
 0x317   :  { %151 = vst.msk [vmem:[#allocation7] sm:$0xff] %vm47_vm0, %v148_v28 }
 0x318   :  { %162 = dma.vmem_to_hbm [thread:$0]  %s158_s22, 128, %s160_s25, [#allocation4]  }
 0x319   :  { %261 = dma.done.wait [#allocation4], 128  }
 0x31a   :  { %262 = vsyncadd [#allocation4], 4294967168 }
 0x31b   :  { %167 = vsyncpa [#allocation3], 1 }
 0x31c   :  { %168 = vsyncpa [#allocation6], 1 }
 0x31d   :  { %169 = vsyncpa [#allocation4], 1 }

</bundles_post_ra>
